<compile_context>
chip_gen: v5e
topology: v5e:2x2
jax: 0.10.0
libtpu: 0.0.40
codegen_flags: <defaults>
</compile_context>

<pallas_src>
import math
import functools

import jax
import jax.numpy as jnp
from jax.experimental import pallas as pl
from jax.experimental.pallas import tpu as pltpu


# Finite mask value (instead of -inf) so exp/max never produce NaN even for
# heavily masked rows.
_MASK_VALUE = -0.7 * float(jnp.finfo(jnp.float32).max)


# ---------------------------------------------------------------------------
# Kernel 1: fused QKV projection (K-tiled over D) + RoPE on the final K step.
# Grid: (batch, seq row tiles, D tiles).  x:(tr,tk1) @ w_qkv:(tk1, NHD+2*NKVD)
# accumulated into an f32 VMEM scratch; RoPE applied with precomputed cos/sin
# halves (pure VPU) and one full-width store per head.
# ---------------------------------------------------------------------------
def qkv_rope_kernel(x_ref, w_ref, cos_ref, sin_ref, q_ref, k_ref, v_ref,
                    acc_ref, *, n_heads, n_kv_heads, head_dim):
    half = head_dim // 2
    nhd = n_heads * head_dim
    nkvd = n_kv_heads * head_dim
    kk = pl.program_id(2)

    @pl.when(kk == 0)
    def _init():
        acc_ref[...] = jnp.zeros_like(acc_ref)

    # Partial fused projection (bf16 operands, f32 accumulation in VMEM scratch).
    acc_ref[...] += jnp.dot(x_ref[...], w_ref[...],
                            preferred_element_type=jnp.float32)

    @pl.when(kk == pl.num_programs(2) - 1)
    def _finalize():
        qkv = acc_ref[...]
        cos = cos_ref[...]          # (tr, half) f32
        sin = sin_ref[...]          # (tr, half) f32

        # Per-head "halves" layout [r_0..r_{half-1} | i_0..i_{half-1}] (weights
        # were permuted in the wrapper): the pair rotation is elementwise math
        # and each rotated head is written with ONE full-width store.
        for h in range(n_heads):
            t = qkv[:, h * head_dim:(h + 1) * head_dim]
            t_r, t_i = t[:, :half], t[:, half:]
            q_ref[h] = jnp.concatenate(
                [t_r * cos - t_i * sin, t_i * cos + t_r * sin],
                axis=-1).astype(q_ref.dtype)

        for h in range(n_kv_heads):
            kb = nhd + h * head_dim
            t = qkv[:, kb:kb + head_dim]
            t_r, t_i = t[:, :half], t[:, half:]
            k_ref[h] = jnp.concatenate(
                [t_r * cos - t_i * sin, t_i * cos + t_r * sin],
                axis=-1).astype(k_ref.dtype)
            vb = nhd + nkvd + h * head_dim
            v_ref[h] = qkv[:, vb:vb + head_dim].astype(v_ref.dtype)


# ---------------------------------------------------------------------------
# Kernel 2: GQA flash attention (online softmax).
# Grid (B, n_kv_heads, q-tiles, kv-tiles): K/V tiles are fetched once per head
# group and shared by all n_rep grouped query heads.
# ---------------------------------------------------------------------------
def flash_attn_kernel(q_ref, k_ref, v_ref, o_ref, m_ref, l_ref, acc_ref):
    ki = pl.program_id(3)
    nkv = pl.num_programs(3)
    g, tq, hd = q_ref.shape            # g = n_rep grouped query heads
    tk = k_ref.shape[0]
    q_start = pl.program_id(2) * tq
    k_start = ki * tk

    @pl.when(ki == 0)
    def _init():
        m_ref[...] = jnp.full(m_ref.shape, -jnp.inf, dtype=m_ref.dtype)
        l_ref[...] = jnp.zeros(l_ref.shape, dtype=l_ref.dtype)
        acc_ref[...] = jnp.zeros(acc_ref.shape, dtype=acc_ref.dtype)

    # Skip KV tiles entirely above the causal diagonal.  NOTE: the "no fully
    # masked row" guarantee relies on tq == tk and tile alignment.
    @pl.when(k_start <= q_start + tq - 1)
    def _compute():
        k = k_ref[...]                                    # (tk, hd) bf16
        v = v_ref[...]                                    # (tk, hd) bf16
        # Causal mask built once per tile and shared across the head group.
        row = q_start + jax.lax.broadcasted_iota(jnp.int32, (tq, tk), 0)
        col = k_start + jax.lax.broadcasted_iota(jnp.int32, (tq, tk), 1)
        causal = row >= col

        for gi in range(g):                               # shared K/V tile
            q = q_ref[gi]                                 # (tq, hd) pre-scaled
            s = jax.lax.dot_general(q, k, (((1,), (1,)), ((), ())),
                                    preferred_element_type=jnp.float32)
            s = jnp.where(causal, s, _MASK_VALUE)

            m_prev = m_ref[gi]
            m_new = jnp.maximum(m_prev, jnp.max(s, axis=-1, keepdims=True))
            alpha = jnp.exp(m_prev - m_new)
            p = jnp.exp(s - m_new)
            l_ref[gi] = alpha * l_ref[gi] + jnp.sum(p, axis=-1, keepdims=True)
            acc_ref[gi] = alpha * acc_ref[gi] + jnp.dot(
                p.astype(v.dtype), v, preferred_element_type=jnp.float32)
            m_ref[gi] = m_new

    @pl.when(ki == nkv - 1)
    def _finalize():
        inv_l = pl.reciprocal(l_ref[...], approx=True)    # fine for bf16 output
        o_ref[...] = (acc_ref[...] * inv_l).astype(o_ref.dtype)


# ---------------------------------------------------------------------------
# Kernel 3: output projection as a grid reduction over heads.
# Grid (B, row tiles, D tiles, heads); per-step weight block is only
# (head_dim, tn) and the accumulator lives in a (tr, tn) f32 VMEM scratch.
# ---------------------------------------------------------------------------
def out_proj_kernel(o_ref, wo_ref, y_ref, acc_ref):
    h = pl.program_id(3)

    @pl.when(h == 0)
    def _init():
        acc_ref[...] = jnp.zeros_like(acc_ref)

    acc_ref[...] += jnp.dot(o_ref[...], wo_ref[...],
                            preferred_element_type=jnp.float32)

    @pl.when(h == pl.num_programs(3) - 1)
    def _finalize():
        y_ref[...] = acc_ref[...].astype(y_ref.dtype)


# ---------------------------------------------------------------------------
# Wrapper
# ---------------------------------------------------------------------------
def _rope_halves_perm(n_heads, head_dim):
    """Column permutation: interleaved (r0,i0,r1,i1,...) -> halves (r...|i...)."""
    half = head_dim // 2
    idx = []
    for h in range(n_heads):
        base = h * head_dim
        idx += [base + 2 * p for p in range(half)]
        idx += [base + 2 * p + 1 for p in range(half)]
    return jnp.asarray(idx, dtype=jnp.int32)


def attention_forward(x, wq, wk, wv, wo, *, n_heads, n_kv_heads, head_dim,
                      rope_theta=500000.0, start_pos=0):
    B, S, D = x.shape
    nhd = n_heads * head_dim
    nkvd = n_kv_heads * head_dim
    nout = nhd + 2 * nkvd
    n_rep = n_heads // n_kv_heads
    half = head_dim // 2
    assert S % 8 == 0 and n_heads % n_kv_heads == 0

    # Wrapper-side constant prep: permute wq/wk into the RoPE "halves" layout
    # (same permutation for q and k within each head -> scores unchanged),
    # fold 1/sqrt(head_dim) into wq, fuse QKV weights, cast MXU operands bf16.
    perm_q = _rope_halves_perm(n_heads, head_dim)
    perm_k = _rope_halves_perm(n_kv_heads, head_dim)
    wq_p = wq[:, perm_q] * (1.0 / math.sqrt(head_dim))
    wk_p = wk[:, perm_k]
    w_qkv = jnp.concatenate([wq_p, wk_p, wv], axis=1).astype(jnp.bfloat16)
    wo3 = wo.reshape(n_heads, head_dim, D).astype(jnp.bfloat16)
    x_bf = x.astype(jnp.bfloat16)

    # RoPE tables (one column per rotary pair).
    inv_freq = 1.0 / (rope_theta ** (jnp.arange(0, head_dim, 2, dtype=jnp.float32)
                                     / head_dim))
    pos = jnp.arange(start_pos, start_pos + S, dtype=jnp.float32)
    angles = jnp.outer(pos, inv_freq)                    # (S, half)
    cos = jnp.cos(angles)
    sin = jnp.sin(angles)

    # Tiles: 256-wide attention tiles (full 256x256 MXU on v6e/v7x, 4x fewer
    # grid steps), K-tiled projection, N-tiled output projection.
    tr = min(S, 256)            # row tile for projection kernels
    tq = tk = min(S, 256)       # flash-attention tiles (must be equal)
    tk1 = min(D, 512)           # K tile for the fused QKV projection
    tn = min(D, 1024)           # N tile for the output projection
    assert S % tr == 0 and S % tq == 0 and D % tk1 == 0 and D % tn == 0

    cparams = functools.partial(pltpu.CompilerParams,
                                vmem_limit_bytes=64 * 1024 * 1024)

    # ---- kernel 1: fused QKV projection (K-tiled) + RoPE -> head-major q/k/v
    q4, k4, v4 = pl.pallas_call(
        functools.partial(qkv_rope_kernel, n_heads=n_heads,
                          n_kv_heads=n_kv_heads, head_dim=head_dim),
        out_shape=(
            jax.ShapeDtypeStruct((B, n_heads, S, head_dim), jnp.bfloat16),
            jax.ShapeDtypeStruct((B, n_kv_heads, S, head_dim), jnp.bfloat16),
            jax.ShapeDtypeStruct((B, n_kv_heads, S, head_dim), jnp.bfloat16),
        ),
        grid=(B, S // tr, D // tk1),
        in_specs=[
            pl.BlockSpec((None, tr, tk1), lambda b, r, k: (b, r, k)),   # x
            pl.BlockSpec((tk1, nout), lambda b, r, k: (k, 0)),          # w_qkv
            pl.BlockSpec((tr, half), lambda b, r, k: (r, 0)),           # cos
            pl.BlockSpec((tr, half), lambda b, r, k: (r, 0)),           # sin
        ],
        out_specs=(
            pl.BlockSpec((None, n_heads, tr, head_dim), lambda b, r, k: (b, 0, r, 0)),
            pl.BlockSpec((None, n_kv_heads, tr, head_dim), lambda b, r, k: (b, 0, r, 0)),
            pl.BlockSpec((None, n_kv_heads, tr, head_dim), lambda b, r, k: (b, 0, r, 0)),
        ),
        scratch_shapes=[pltpu.VMEM((tr, nout), jnp.float32)],
        compiler_params=cparams(
            dimension_semantics=("parallel", "parallel", "arbitrary")),
    )(x_bf, w_qkv, cos, sin)

    # ---- kernel 2: GQA flash attention, grid (B, KVH, q-tiles, kv-tiles)
    nq, nkv = S // tq, S // tk

    def q_map(b, hk, qi, ki):
        # Block of n_rep grouped query heads starting at kv head hk.
        return (b, hk, qi, 0)

    def kv_map(b, hk, qi, ki):
        # Clamp ki so fully-masked (skipped) causal tiles don't trigger new DMAs.
        ki_c = jnp.minimum(ki, (qi * tq + tq - 1) // tk)
        return (b, hk, ki_c, 0)

    o4 = pl.pallas_call(
        flash_attn_kernel,
        out_shape=jax.ShapeDtypeStruct((B, n_heads, S, head_dim), jnp.bfloat16),
        grid=(B, n_kv_heads, nq, nkv),
        in_specs=[
            pl.BlockSpec((None, n_rep, tq, head_dim), q_map),   # q (head group)
            pl.BlockSpec((None, None, tk, head_dim), kv_map),   # k (shared)
            pl.BlockSpec((None, None, tk, head_dim), kv_map),   # v (shared)
        ],
        out_specs=pl.BlockSpec((None, n_rep, tq, head_dim), q_map),
        scratch_shapes=[
            pltpu.VMEM((n_rep, tq, 1), jnp.float32),            # running max
            pltpu.VMEM((n_rep, tq, 1), jnp.float32),            # running sum
            pltpu.VMEM((n_rep, tq, head_dim), jnp.float32),     # output accum
        ],
        compiler_params=cparams(
            dimension_semantics=("parallel", "parallel", "parallel", "arbitrary")),
        cost_estimate=pl.CostEstimate(
            # ~0.5x of the dense 4*B*H*S^2*hd thanks to causal tile skipping.
            flops=2 * B * n_heads * S * S * head_dim,
            transcendentals=B * n_heads * S * S // 2,
            bytes_accessed=(2 * q4.size * q4.dtype.itemsize
                            + (k4.size + v4.size) * k4.dtype.itemsize
                            * max(1, (S // tq) // 2)),
        ),
    )(q4, k4, v4)

    # ---- kernel 3: output projection, reduction over heads, D tiled.
    y = pl.pallas_call(
        out_proj_kernel,
        out_shape=jax.ShapeDtypeStruct((B, S, D), x.dtype),
        grid=(B, S // tr, D // tn, n_heads),
        in_specs=[
            pl.BlockSpec((None, None, tr, head_dim), lambda b, r, n, h: (b, h, r, 0)),
            pl.BlockSpec((None, head_dim, tn), lambda b, r, n, h: (h, 0, n)),
        ],
        out_specs=pl.BlockSpec((None, tr, tn), lambda b, r, n, h: (b, r, n)),
        scratch_shapes=[pltpu.VMEM((tr, tn), jnp.float32)],
        compiler_params=cparams(
            dimension_semantics=("parallel", "parallel", "parallel", "arbitrary")),
    )(o4, wo3)
    return y


# ---------------------------------------------------------------------------
# Pure-JAX reference (transcription of the PyTorch Attention.forward, causal).
# ---------------------------------------------------------------------------
def reference(x, wq, wk, wv, wo, *, n_heads, n_kv_heads, head_dim,
              rope_theta=500000.0, start_pos=0):
    B, S, D = x.shape
    n_rep = n_heads // n_kv_heads
    xq = (x @ wq).reshape(B, S, n_heads, head_dim)
    xk = (x @ wk).reshape(B, S, n_kv_heads, head_dim)
    xv = (x @ wv).reshape(B, S, n_kv_heads, head_dim)

    inv_freq = 1.0 / (rope_theta ** (jnp.arange(0, head_dim, 2, dtype=jnp.float32)
                                     / head_dim))
    pos = jnp.arange(start_pos, start_pos + S, dtype=jnp.float32)
    angles = jnp.outer(pos, inv_freq)                  # (S, half)
    cos = jnp.cos(angles)[None, :, None, :]
    sin = jnp.sin(angles)[None, :, None, :]

    def rope(t):
        t_r, t_i = t[..., 0::2], t[..., 1::2]
        out_r = t_r * cos - t_i * sin
        out_i = t_r * sin + t_i * cos
        return jnp.stack([out_r, out_i], axis=-1).reshape(t.shape)

    xq, xk = rope(xq), rope(xk)
    xk = jnp.repeat(xk, n_rep, axis=2)
    xv = jnp.repeat(xv, n_rep, axis=2)
    q = xq.transpose(0, 2, 1, 3)
    k = xk.transpose(0, 2, 1, 3)
    v = xv.transpose(0, 2, 1, 3)
    mask = jnp.triu(jnp.full((S, S), -jnp.inf, dtype=jnp.float32), k=1)
    s = jnp.einsum('bhqd,bhkd->bhqk', q, k) / math.sqrt(head_dim) + mask
    p = jax.nn.softmax(s.astype(jnp.float32), axis=-1)
    o = jnp.einsum('bhqk,bhkd->bhqd', p, v)
    o = o.transpose(0, 2, 1, 3).reshape(B, S, -1)
    return o @ wo


if __name__ == "__main__":
    # Small ModelArgs-consistent shapes.
    B, S = 2, 8
    dim, n_heads, n_kv_heads = 64, 4, 2
    head_dim = dim // n_heads            # 16

    key = jax.random.PRNGKey(0)
    kx, kq, kk, kv, ko = jax.random.split(key, 5)
    x = jax.random.normal(kx, (B, S, dim), dtype=jnp.float32)
    # Weights stored pre-transposed as (in_features, out_features).
    wq = jax.random.normal(kq, (dim, n_heads * head_dim), dtype=jnp.float32) * 0.05
    wk = jax.random.normal(kk, (dim, n_kv_heads * head_dim), dtype=jnp.float32) * 0.05
    wv = jax.random.normal(kv, (dim, n_kv_heads * head_dim), dtype=jnp.float32) * 0.05
    wo = jax.random.normal(ko, (n_heads * head_dim, dim), dtype=jnp.float32) * 0.05

    out = attention_forward(x, wq, wk, wv, wo, n_heads=n_heads,
                            n_kv_heads=n_kv_heads, head_dim=head_dim)
    out = jax.block_until_ready(out)

    ref = reference(x, wq, wk, wv, wo, n_heads=n_heads,
                    n_kv_heads=n_kv_heads, head_dim=head_dim)
    err = float(jnp.max(jnp.abs(out - ref)))
    assert err < 2e-2, f"max abs error too large: {err}"
    print("KERNEL_OK")
</pallas_src>

<mosaic_0001>
module attributes {stable_mosaic.version = 11 : i64} {
  func.func @qkv_rope_kernel(%arg0: i32, %arg1: i32, %arg2: i32, %arg3: memref<1x8x64xbf16, #tpu.memory_space<vmem>>, %arg4: memref<64x128xbf16, #tpu.memory_space<vmem>>, %arg5: memref<8x8xf32, #tpu.memory_space<vmem>>, %arg6: memref<8x8xf32, #tpu.memory_space<vmem>>, %arg7: memref<1x4x8x16xbf16, #tpu.memory_space<vmem>>, %arg8: memref<1x2x8x16xbf16, #tpu.memory_space<vmem>>, %arg9: memref<1x2x8x16xbf16, #tpu.memory_space<vmem>>, %arg10: memref<8x128xf32, #tpu.memory_space<vmem>>) attributes {dimension_semantics = [#tpu.dimension_semantics<parallel>, #tpu.dimension_semantics<parallel>, #tpu.dimension_semantics<arbitrary>], iteration_bounds = array<i64: 2, 1, 1>, scalar_prefetch = 0 : i64, scratch_operands = 1 : i64, tpu.core_type = #tpu.core_type<tc>, window_params = [{transform_indices = @transform_0, window_bounds = array<i64: 1, 8, 64>}, {transform_indices = @transform_1, window_bounds = array<i64: 64, 128>}, {transform_indices = @transform_2, window_bounds = array<i64: 8, 8>}, {transform_indices = @transform_3, window_bounds = array<i64: 8, 8>}, {transform_indices = @transform_4, window_bounds = array<i64: 1, 4, 8, 16>}, {transform_indices = @transform_5, window_bounds = array<i64: 1, 2, 8, 16>}, {transform_indices = @transform_6, window_bounds = array<i64: 1, 2, 8, 16>}]} {
    %c0_i32 = arith.constant 0 : i32
    %0 = arith.cmpi eq, %arg2, %c0_i32 : i32
    %1 = arith.extui %0 : i1 to i32
    %c0_i32_0 = arith.constant 0 : i32
    %2 = arith.cmpi ne, %1, %c0_i32_0 : i32
    scf.if %2 {
      %cst_11 = arith.constant 0.000000e+00 : f32
      %13 = vector.broadcast %cst_11 : f32 to vector<8x128xf32>
      %c0_12 = arith.constant 0 : index
      %c0_13 = arith.constant 0 : index
      %14 = vector.load %arg10[%c0_12, %c0_13] : memref<8x128xf32, #tpu.memory_space<vmem>>, vector<8x128xf32>
      tpu.vector_store %arg10[%c0_12, %c0_13], %13 {strides = array<i32>} : memref<8x128xf32, #tpu.memory_space<vmem>>, vector<8x128xf32>,
    } else {
    }
    %c0 = arith.constant 0 : index
    %c0_1 = arith.constant 0 : index
    %3 = vector.load %arg10[%c0, %c0_1] : memref<8x128xf32, #tpu.memory_space<vmem>>, vector<8x128xf32>
    %c0_2 = arith.constant 0 : index
    %c0_3 = arith.constant 0 : index
    %c0_4 = arith.constant 0 : index
    %4 = vector.load %arg3[%c0_2, %c0_3, %c0_4] : memref<1x8x64xbf16, #tpu.memory_space<vmem>>, vector<1x8x64xbf16>
    %5 = vector.shape_cast %4 : vector<1x8x64xbf16> to vector<8x64xbf16>
    %c0_5 = arith.constant 0 : index
    %c0_6 = arith.constant 0 : index
    %6 = vector.load %arg4[%c0_5, %c0_6] : memref<64x128xbf16, #tpu.memory_space<vmem>>, vector<64x128xbf16>
    %cst = arith.constant dense<0.000000e+00> : vector<8x128xf32>
    %7 = tpu.matmul %5, %6, %cst {dimension_numbers = #tpu.dot_dimension_numbers<[1], [0], [0], [1], [0, 0, 1, 1], [], []>} : vector<8x64xbf16>, vector<64x128xbf16>, vector<8x128xf32> -> vector<8x128xf32>
    %8 = arith.addf %3, %7 : vector<8x128xf32>
    %c0_7 = arith.constant 0 : index
    %c0_8 = arith.constant 0 : index
    %9 = vector.load %arg10[%c0_7, %c0_8] : memref<8x128xf32, #tpu.memory_space<vmem>>, vector<8x128xf32>
    tpu.vector_store %arg10[%c0_7, %c0_8], %8 {strides = array<i32>} : memref<8x128xf32, #tpu.memory_space<vmem>>, vector<8x128xf32>,
    %c0_i32_9 = arith.constant 0 : i32
    %10 = arith.cmpi eq, %arg2, %c0_i32_9 : i32
    %11 = arith.extui %10 : i1 to i32
    %c0_i32_10 = arith.constant 0 : i32
    %12 = arith.cmpi ne, %11, %c0_i32_10 : i32
    scf.if %12 {
      %c0_11 = arith.constant 0 : index
      %c0_12 = arith.constant 0 : index
      %13 = vector.load %arg10[%c0_11, %c0_12] : memref<8x128xf32, #tpu.memory_space<vmem>>, vector<8x128xf32>
      %c0_13 = arith.constant 0 : index
      %c0_14 = arith.constant 0 : index
      %14 = vector.load %arg5[%c0_13, %c0_14] : memref<8x8xf32, #tpu.memory_space<vmem>>, vector<8x8xf32>
      %c0_15 = arith.constant 0 : index
      %c0_16 = arith.constant 0 : index
      %15 = vector.load %arg6[%c0_15, %c0_16] : memref<8x8xf32, #tpu.memory_space<vmem>>, vector<8x8xf32>
      %16 = vector.extract_strided_slice %13 {offsets = [0, 0], sizes = [8, 16], strides = [1, 1]} : vector<8x128xf32> to vector<8x16xf32>
      %17 = vector.extract_strided_slice %16 {offsets = [0, 0], sizes = [8, 8], strides = [1, 1]} : vector<8x16xf32> to vector<8x8xf32>
      %18 = vector.extract_strided_slice %16 {offsets = [0, 8], sizes = [8, 8], strides = [1, 1]} : vector<8x16xf32> to vector<8x8xf32>
      %19 = arith.mulf %17, %14 : vector<8x8xf32>
      %20 = arith.mulf %18, %15 : vector<8x8xf32>
      %21 = arith.subf %19, %20 : vector<8x8xf32>
      %22 = arith.mulf %18, %14 : vector<8x8xf32>
      %23 = arith.mulf %17, %15 : vector<8x8xf32>
      %24 = arith.addf %22, %23 : vector<8x8xf32>
      %25 = tpu.concatenate %21, %24 in 1 : vector<8x8xf32>, vector<8x8xf32> -> vector<8x16xf32>
      %26 = arith.truncf %25 : vector<8x16xf32> to vector<8x16xbf16>
      %c0_17 = arith.constant 0 : index
      %c0_18 = arith.constant 0 : index
      %c0_19 = arith.constant 0 : index
      %c0_20 = arith.constant 0 : index
      %27 = vector.load %arg7[%c0_17, %c0_18, %c0_19, %c0_20] : memref<1x4x8x16xbf16, #tpu.memory_space<vmem>>, vector<1x1x8x16xbf16>
      %28 = vector.shape_cast %27 : vector<1x1x8x16xbf16> to vector<8x16xbf16>
      %29 = vector.shape_cast %26 : vector<8x16xbf16> to vector<1x1x8x16xbf16>
      tpu.vector_store %arg7[%c0_17, %c0_18, %c0_19, %c0_20], %29 {strides = array<i32>} : memref<1x4x8x16xbf16, #tpu.memory_space<vmem>>, vector<1x1x8x16xbf16>,
      %30 = vector.extract_strided_slice %13 {offsets = [0, 16], sizes = [8, 16], strides = [1, 1]} : vector<8x128xf32> to vector<8x16xf32>
      %31 = vector.extract_strided_slice %30 {offsets = [0, 0], sizes = [8, 8], strides = [1, 1]} : vector<8x16xf32> to vector<8x8xf32>
      %32 = vector.extract_strided_slice %30 {offsets = [0, 8], sizes = [8, 8], strides = [1, 1]} : vector<8x16xf32> to vector<8x8xf32>
      %33 = arith.mulf %31, %14 : vector<8x8xf32>
      %34 = arith.mulf %32, %15 : vector<8x8xf32>
      %35 = arith.subf %33, %34 : vector<8x8xf32>
      %36 = arith.mulf %32, %14 : vector<8x8xf32>
      %37 = arith.mulf %31, %15 : vector<8x8xf32>
      %38 = arith.addf %36, %37 : vector<8x8xf32>
      %39 = tpu.concatenate %35, %38 in 1 : vector<8x8xf32>, vector<8x8xf32> -> vector<8x16xf32>
      %40 = arith.truncf %39 : vector<8x16xf32> to vector<8x16xbf16>
      %c0_21 = arith.constant 0 : index
      %c1 = arith.constant 1 : index
      %c0_22 = arith.constant 0 : index
      %c0_23 = arith.constant 0 : index
      %41 = vector.load %arg7[%c0_21, %c1, %c0_22, %c0_23] : memref<1x4x8x16xbf16, #tpu.memory_space<vmem>>, vector<1x1x8x16xbf16>
      %42 = vector.shape_cast %41 : vector<1x1x8x16xbf16> to vector<8x16xbf16>
      %43 = vector.shape_cast %40 : vector<8x16xbf16> to vector<1x1x8x16xbf16>
      tpu.vector_store %arg7[%c0_21, %c1, %c0_22, %c0_23], %43 {strides = array<i32>} : memref<1x4x8x16xbf16, #tpu.memory_space<vmem>>, vector<1x1x8x16xbf16>,
      %44 = vector.extract_strided_slice %13 {offsets = [0, 32], sizes = [8, 16], strides = [1, 1]} : vector<8x128xf32> to vector<8x16xf32>
      %45 = vector.extract_strided_slice %44 {offsets = [0, 0], sizes = [8, 8], strides = [1, 1]} : vector<8x16xf32> to vector<8x8xf32>
      %46 = vector.extract_strided_slice %44 {offsets = [0, 8], sizes = [8, 8], strides = [1, 1]} : vector<8x16xf32> to vector<8x8xf32>
      %47 = arith.mulf %45, %14 : vector<8x8xf32>
      %48 = arith.mulf %46, %15 : vector<8x8xf32>
      %49 = arith.subf %47, %48 : vector<8x8xf32>
      %50 = arith.mulf %46, %14 : vector<8x8xf32>
      %51 = arith.mulf %45, %15 : vector<8x8xf32>
      %52 = arith.addf %50, %51 : vector<8x8xf32>
      %53 = tpu.concatenate %49, %52 in 1 : vector<8x8xf32>, vector<8x8xf32> -> vector<8x16xf32>
      %54 = arith.truncf %53 : vector<8x16xf32> to vector<8x16xbf16>
      %c0_24 = arith.constant 0 : index
      %c2 = arith.constant 2 : index
      %c0_25 = arith.constant 0 : index
      %c0_26 = arith.constant 0 : index
      %55 = vector.load %arg7[%c0_24, %c2, %c0_25, %c0_26] : memref<1x4x8x16xbf16, #tpu.memory_space<vmem>>, vector<1x1x8x16xbf16>
      %56 = vector.shape_cast %55 : vector<1x1x8x16xbf16> to vector<8x16xbf16>
      %57 = vector.shape_cast %54 : vector<8x16xbf16> to vector<1x1x8x16xbf16>
      tpu.vector_store %arg7[%c0_24, %c2, %c0_25, %c0_26], %57 {strides = array<i32>} : memref<1x4x8x16xbf16, #tpu.memory_space<vmem>>, vector<1x1x8x16xbf16>,
      %58 = vector.extract_strided_slice %13 {offsets = [0, 48], sizes = [8, 16], strides = [1, 1]} : vector<8x128xf32> to vector<8x16xf32>
      %59 = vector.extract_strided_slice %58 {offsets = [0, 0], sizes = [8, 8], strides = [1, 1]} : vector<8x16xf32> to vector<8x8xf32>
      %60 = vector.extract_strided_slice %58 {offsets = [0, 8], sizes = [8, 8], strides = [1, 1]} : vector<8x16xf32> to vector<8x8xf32>
      %61 = arith.mulf %59, %14 : vector<8x8xf32>
      %62 = arith.mulf %60, %15 : vector<8x8xf32>
      %63 = arith.subf %61, %62 : vector<8x8xf32>
      %64 = arith.mulf %60, %14 : vector<8x8xf32>
      %65 = arith.mulf %59, %15 : vector<8x8xf32>
      %66 = arith.addf %64, %65 : vector<8x8xf32>
      %67 = tpu.concatenate %63, %66 in 1 : vector<8x8xf32>, vector<8x8xf32> -> vector<8x16xf32>
      %68 = arith.truncf %67 : vector<8x16xf32> to vector<8x16xbf16>
      %c0_27 = arith.constant 0 : index
      %c3 = arith.constant 3 : index
      %c0_28 = arith.constant 0 : index
      %c0_29 = arith.constant 0 : index
      %69 = vector.load %arg7[%c0_27, %c3, %c0_28, %c0_29] : memref<1x4x8x16xbf16, #tpu.memory_space<vmem>>, vector<1x1x8x16xbf16>
      %70 = vector.shape_cast %69 : vector<1x1x8x16xbf16> to vector<8x16xbf16>
      %71 = vector.shape_cast %68 : vector<8x16xbf16> to vector<1x1x8x16xbf16>
      tpu.vector_store %arg7[%c0_27, %c3, %c0_28, %c0_29], %71 {strides = array<i32>} : memref<1x4x8x16xbf16, #tpu.memory_space<vmem>>, vector<1x1x8x16xbf16>,
      %72 = vector.extract_strided_slice %13 {offsets = [0, 64], sizes = [8, 16], strides = [1, 1]} : vector<8x128xf32> to vector<8x16xf32>
      %73 = vector.extract_strided_slice %72 {offsets = [0, 0], sizes = [8, 8], strides = [1, 1]} : vector<8x16xf32> to vector<8x8xf32>
      %74 = vector.extract_strided_slice %72 {offsets = [0, 8], sizes = [8, 8], strides = [1, 1]} : vector<8x16xf32> to vector<8x8xf32>
      %75 = arith.mulf %73, %14 : vector<8x8xf32>
      %76 = arith.mulf %74, %15 : vector<8x8xf32>
      %77 = arith.subf %75, %76 : vector<8x8xf32>
      %78 = arith.mulf %74, %14 : vector<8x8xf32>
      %79 = arith.mulf %73, %15 : vector<8x8xf32>
      %80 = arith.addf %78, %79 : vector<8x8xf32>
      %81 = tpu.concatenate %77, %80 in 1 : vector<8x8xf32>, vector<8x8xf32> -> vector<8x16xf32>
      %82 = arith.truncf %81 : vector<8x16xf32> to vector<8x16xbf16>
      %c0_30 = arith.constant 0 : index
      %c0_31 = arith.constant 0 : index
      %c0_32 = arith.constant 0 : index
      %c0_33 = arith.constant 0 : index
      %83 = vector.load %arg8[%c0_30, %c0_31, %c0_32, %c0_33] : memref<1x2x8x16xbf16, #tpu.memory_space<vmem>>, vector<1x1x8x16xbf16>
      %84 = vector.shape_cast %83 : vector<1x1x8x16xbf16> to vector<8x16xbf16>
      %85 = vector.shape_cast %82 : vector<8x16xbf16> to vector<1x1x8x16xbf16>
      tpu.vector_store %arg8[%c0_30, %c0_31, %c0_32, %c0_33], %85 {strides = array<i32>} : memref<1x2x8x16xbf16, #tpu.memory_space<vmem>>, vector<1x1x8x16xbf16>,
      %86 = vector.extract_strided_slice %13 {offsets = [0, 96], sizes = [8, 16], strides = [1, 1]} : vector<8x128xf32> to vector<8x16xf32>
      %87 = arith.truncf %86 : vector<8x16xf32> to vector<8x16xbf16>
      %c0_34 = arith.constant 0 : index
      %c0_35 = arith.constant 0 : index
      %c0_36 = arith.constant 0 : index
      %c0_37 = arith.constant 0 : index
      %88 = vector.load %arg9[%c0_34, %c0_35, %c0_36, %c0_37] : memref<1x2x8x16xbf16, #tpu.memory_space<vmem>>, vector<1x1x8x16xbf16>
      %89 = vector.shape_cast %88 : vector<1x1x8x16xbf16> to vector<8x16xbf16>
      %90 = vector.shape_cast %87 : vector<8x16xbf16> to vector<1x1x8x16xbf16>
      tpu.vector_store %arg9[%c0_34, %c0_35, %c0_36, %c0_37], %90 {strides = array<i32>} : memref<1x2x8x16xbf16, #tpu.memory_space<vmem>>, vector<1x1x8x16xbf16>,
      %91 = vector.extract_strided_slice %13 {offsets = [0, 80], sizes = [8, 16], strides = [1, 1]} : vector<8x128xf32> to vector<8x16xf32>
      %92 = vector.extract_strided_slice %91 {offsets = [0, 0], sizes = [8, 8], strides = [1, 1]} : vector<8x16xf32> to vector<8x8xf32>
      %93 = vector.extract_strided_slice %91 {offsets = [0, 8], sizes = [8, 8], strides = [1, 1]} : vector<8x16xf32> to vector<8x8xf32>
      %94 = arith.mulf %92, %14 : vector<8x8xf32>
      %95 = arith.mulf %93, %15 : vector<8x8xf32>
      %96 = arith.subf %94, %95 : vector<8x8xf32>
      %97 = arith.mulf %93, %14 : vector<8x8xf32>
      %98 = arith.mulf %92, %15 : vector<8x8xf32>
      %99 = arith.addf %97, %98 : vector<8x8xf32>
      %100 = tpu.concatenate %96, %99 in 1 : vector<8x8xf32>, vector<8x8xf32> -> vector<8x16xf32>
      %101 = arith.truncf %100 : vector<8x16xf32> to vector<8x16xbf16>
      %c0_38 = arith.constant 0 : index
      %c1_39 = arith.constant 1 : index
      %c0_40 = arith.constant 0 : index
      %c0_41 = arith.constant 0 : index
      %102 = vector.load %arg8[%c0_38, %c1_39, %c0_40, %c0_41] : memref<1x2x8x16xbf16, #tpu.memory_space<vmem>>, vector<1x1x8x16xbf16>
      %103 = vector.shape_cast %102 : vector<1x1x8x16xbf16> to vector<8x16xbf16>
      %104 = vector.shape_cast %101 : vector<8x16xbf16> to vector<1x1x8x16xbf16>
      tpu.vector_store %arg8[%c0_38, %c1_39, %c0_40, %c0_41], %104 {strides = array<i32>} : memref<1x2x8x16xbf16, #tpu.memory_space<vmem>>, vector<1x1x8x16xbf16>,
      %105 = vector.extract_strided_slice %13 {offsets = [0, 112], sizes = [8, 16], strides = [1, 1]} : vector<8x128xf32> to vector<8x16xf32>
      %106 = arith.truncf %105 : vector<8x16xf32> to vector<8x16xbf16>
      %c0_42 = arith.constant 0 : index
      %c1_43 = arith.constant 1 : index
      %c0_44 = arith.constant 0 : index
      %c0_45 = arith.constant 0 : index
      %107 = vector.load %arg9[%c0_42, %c1_43, %c0_44, %c0_45] : memref<1x2x8x16xbf16, #tpu.memory_space<vmem>>, vector<1x1x8x16xbf16>
      %108 = vector.shape_cast %107 : vector<1x1x8x16xbf16> to vector<8x16xbf16>
      %109 = vector.shape_cast %106 : vector<8x16xbf16> to vector<1x1x8x16xbf16>
      tpu.vector_store %arg9[%c0_42, %c1_43, %c0_44, %c0_45], %109 {strides = array<i32>} : memref<1x2x8x16xbf16, #tpu.memory_space<vmem>>, vector<1x1x8x16xbf16>,
    } else {
    }
    return
  }
  func.func @transform_0(%arg0: i32, %arg1: i32, %arg2: i32) -> (i32, i32, i32) {
    %c0_i32 = arith.constant 0 : i32
    return %arg0, %arg1, %arg2 : i32, i32, i32
  }
  func.func @transform_1(%arg0: i32, %arg1: i32, %arg2: i32) -> (i32, i32) {
    %c0_i32 = arith.constant 0 : i32
    %c0_i32_0 = arith.constant 0 : i32
    return %arg2, %c0_i32 : i32, i32
  }
  func.func @transform_2(%arg0: i32, %arg1: i32, %arg2: i32) -> (i32, i32) {
    %c0_i32 = arith.constant 0 : i32
    %c0_i32_0 = arith.constant 0 : i32
    return %arg1, %c0_i32 : i32, i32
  }
  func.func @transform_3(%arg0: i32, %arg1: i32, %arg2: i32) -> (i32, i32) {
    %c0_i32 = arith.constant 0 : i32
    %c0_i32_0 = arith.constant 0 : i32
    return %arg1, %c0_i32 : i32, i32
  }
  func.func @transform_4(%arg0: i32, %arg1: i32, %arg2: i32) -> (i32, i32, i32, i32) {
    %c0_i32 = arith.constant 0 : i32
    %c0_i32_0 = arith.constant 0 : i32
    %c0_i32_1 = arith.constant 0 : i32
    return %arg0, %c0_i32, %arg1, %c0_i32_0 : i32, i32, i32, i32
  }
  func.func @transform_5(%arg0: i32, %arg1: i32, %arg2: i32) -> (i32, i32, i32, i32) {
    %c0_i32 = arith.constant 0 : i32
    %c0_i32_0 = arith.constant 0 : i32
    %c0_i32_1 = arith.constant 0 : i32
    return %arg0, %c0_i32, %arg1, %c0_i32_0 : i32, i32, i32, i32
  }
  func.func @transform_6(%arg0: i32, %arg1: i32, %arg2: i32) -> (i32, i32, i32, i32) {
    %c0_i32 = arith.constant 0 : i32
    %c0_i32_0 = arith.constant 0 : i32
    %c0_i32_1 = arith.constant 0 : i32
    return %arg0, %c0_i32, %arg1, %c0_i32_0 : i32, i32, i32, i32
  }
}

</mosaic_0001>

<bundles_post_ra>
// kernel: tpu_custom_call.1
= control target key start
LH: loop header
LB: loop body
LE: loop exit
PB: predicated region body
PF: predicated region fallthrough
CT: control target
= control target key end

     0   :  { %s1779_s0 = inlined_call_operand.hbm [shape: bf16[2,8,64], index: 0, kind: input, shape index: {}]   ;;  %s1780_s1 = inlined_call_operand.hbm [shape: bf16[64,128], index: 1, kind: input, shape index: {}]   ;;  %s1781_s2 = inlined_call_operand.hbm [shape: f32[8,8], index: 2, kind: input, shape index: {}]   ;;  %s1782_s3 = inlined_call_operand.hbm [shape: f32[8,8], index: 3, kind: input, shape index: {}]   ;;  %s1783_s4 = inlined_call_operand.hbm [shape: bf16[2,4,8,16], index: 4, kind: output, shape index: {0}]   ;;  %s1784_s5 = inlined_call_operand.hbm [shape: bf16[2,2,8,16], index: 5, kind: output, shape index: {1}]   ;;  %s1785_s6 = inlined_call_operand.hbm [shape: bf16[2,2,8,16], index: 6, kind: output, shape index: {2}]  }
   0x1   :  { %1792 = sst [smem:[#allocation20_spill]] %s1779_s0 }
   0x2   :  { %1793 = sst [smem:[#allocation21_spill]] %s1780_s1 }
   0x3   :  { %12 = vsyncpa [#allocation4], 0 }
   0x4   :  { %14 = vsyncpa [#allocation4 + $0x1], 0 }
   0x5   :  { %15 = vsyncpa [#allocation7], 0 }
   0x6   :  { %16 = vsyncpa [#allocation10], 0 }
   0x7   :  { %17 = vsyncpa [#allocation5], 0 }
   0x8   :  { %19 = vsyncpa [#allocation5 + $0x1], 0 }
   0x9   :  { %20 = vsyncpa [#allocation13], 0 }
   0xa   :  { %22 = vsyncpa [#allocation13 + $0x1], 0  ;;  %s1461_s21 = smov 0   ;;  %s1463_s22 = smov 0  }
   0xb   :  { %s1465_s23 = smov 0   ;;  %s1467_s24 = smov 0  }
   0xc   :  { %s1469_s25 = smov 0   ;;  %s1471_s26 = smov 0  }
   0xd LB: > { %s1492_s27 = sadd.s32 4294967295, %s1404_s26   ;;  %p934_p0 = scmp.ge.s32.totalorder %s1404_s26, 1  ;;  %s1404_s26 = sphi %s1471_s26, %s28_s26   ;;  %s1400_s25 = sphi %s1469_s25, %s1810_s25   ;;  %s1396_s24 = sphi %s1467_s24, %s1809_s24   ;;  %s1392_s23 = sphi %s1465_s23, %s1808_s23   ;;  %s1388_s22 = sphi %s1463_s22, %s1807_s22   ;;  %s1384_s21 = sphi %s1461_s21, %s1806_s21  }
   0xe   : > { %p72_p1 = scmp.eq.s32.totalorder %s1492_s27, 0  ;;  %p244_p2 = scmp.lt.s32.totalorder %s1404_s26, 3 }
   0xf   : > { %s1794_s1 = sld [smem:[#allocation21_spill]]  ;;  %s1406_s8 = smov [#allocation6]  }
  0x10   : > { %p1500_p3 = pnand %p934_p0, %p244_p2  ;;  %s260_s9 = sshll.u32 %s1406_s8, 4  ;;  %s261_s9 = int_to_ptr.vmem [resolvable:$true] %s260_s9 }
  0x11   : > { %p938_p6 = scmp.ge.s32.totalorder %s1404_s26, 2  ;;  %s275_s13 = sshll.u32 %s1781_s2, 4  ;;  %s276_s13 = int_to_ptr.hbm [resolvable:$true] %s275_s13 }
  0x12   : > { %p1009_p4 = pneg %p1500_p3  ;;  %s1407_s14 = smov 64  }
  0x13   : > { %s1408_s15 = smov 4   ;;  %s1409_s16 = smov [#allocation8]  }
  0x14   : > { %p1508_p5 = pnand %p1009_p4, %p72_p1  ;;  %s277_s17 = sshll.u32 %s1409_s16, 4  ;;  %s278_s17 = int_to_ptr.vmem [resolvable:$true] %s277_s17 }
  0x15   : > { %s258_s30 = sshll.u32 %s1794_s1, 4  ;;  %s289_s20 = sshll.u32 %s1782_s3, 4  ;;  %s259_s30 = int_to_ptr.hbm [resolvable:$true] %s258_s30  ;;  %s290_s20 = int_to_ptr.hbm [resolvable:$true] %s289_s20 }
  0x16   : > { %1012 = dma.hbm_to_vmem [thread:$0]  (!%p1508_p5), %s259_s30, 512, %s261_s9, [#allocation7], %s1407_s14, %s1407_s14, %s1408_s15  }
  0x17   : > { %1015 = dma.hbm_to_vmem [thread:$0]  (!%p1508_p5), %s276_s13, 128, %s278_s17, [#allocation7]  }
  0x18   : > { %s1410_s28 = smov [#allocation9]   ;;  %s1786_s30 = sadd.s32 4294967294, %s1404_s26  }
  0x19   : > { %s291_s29 = sshll.u32 %s1410_s28, 4  ;;  %s47_s8 = sadd.s32 1, %s1400_s25  ;;  %s292_s29 = int_to_ptr.vmem [resolvable:$true] %s291_s29 }
  0x1a   : > { %1018 = dma.hbm_to_vmem [thread:$0]  (!%p1508_p5), %s290_s20, 128, %s292_s29, [#allocation10]  }
  0x1b   : > { %s58_s9 = sadd.s32 1, %s1392_s23  ;;  %p49_p7 = scmp.ge.s32.totalorder %s47_s8, 2 }
  0x1c   : > { %p65_p8 = scmp.ne.s32.totalorder %s1392_s23, %s1388_s22  ;;  %p66_p9 = scmp.eq.s32.totalorder %s1404_s26, 0 }
  0x1d   : > { %p71_p10 = scmp.ne.s32.totalorder %s1388_s22, %s1384_s21  ;;  %s1812_s8 = smov (%p49_p7, %s47_s8), 0 }
  0x1e   : > { %p1535_p11 = por %p66_p9, %p65_p8  ;;  %s51_s12 = ssub.s32 %s1400_s25, %s1812_s8 }
  0x1f   : > { %p1541_p12 = por %p72_p1, %p71_p10  ;;  %p175_p13 = scmp.eq.s32.totalorder %s1492_s27, 1 }
  0x20   : > { %p56_p0 = scmp.eq.s32.totalorder %s51_s12, 0  ;;  %p181_p2 = scmp.eq.s32.totalorder %s1786_s30, 1 }
  0x21   : > { %p1550_p4 = por %p175_p13, %p65_p8  ;;  %p1036_p5 = scmp.lt.s32.totalorder %s1404_s26, 2 }
  0x22   : > { %s1556_s14 = scalar_select %p56_p0, %s1392_s23, %s58_s9  }
  0x23   : > { %p1558_p7 = por %p181_p2, %p71_p10  ;;  %s302_s16 = sand.u32 1, %s1392_s23  }
  0x24   : > { %s939_s17 = sshll.u32 %s302_s16, 2  ;;  %s940_s18 = sshll.u32 %s1400_s25, 2 }
  0x25   : > { %s1801_s0 = sld [smem:[#allocation20_spill]]  ;;  %s306_s29 = scalar_lea.vmem [#allocation3], %s939_s17 }
  0x26   : > { %s316_s12 = sshll.u32 %s306_s29, 4  ;;  %p1020_p8 = pnand %p1036_p5, %p1535_p11  ;;  %s317_s12 = int_to_ptr.vmem [resolvable:$true] %s316_s12 }
  0x27   : > { %s303_s9 = scalar_lea.sflag [#allocation4], %s302_s16  ;;  %s1572_s1 = sand.u32 (!%p1500_p3), 1, %s1388_s22  }
  0x28   : > { %s942_s19 = sshll.u32 (!%p1500_p3), %s1572_s1, 2 }
  0x29   : > { %325 = sbr.rel (%p1500_p3) target bundleno = 480 (0x1e0), region = 36  ;;  %s331_s17 = scalar_lea.vmem (!%p1500_p3), [#allocation3], %s942_s19 }
  0x2b   : > { %s312_s28 = scalar_lea.hbm %s1801_s0, %s940_s18  ;;  %s328_s18 = scalar_lea.sflag (!%p1500_p3), [#allocation4], %s1572_s1 }
  0x2c   : > { %s314_s30 = sshll.u32 %s312_s28, 4  ;;  %s315_s30 = int_to_ptr.hbm [resolvable:$true] %s314_s30 }
  0x2d   : > { %1022 = dma.hbm_to_vmem [thread:$0]  (!%p1020_p8), %s315_s30, 64, %s317_s12, %s303_s9  }
  0x2e   : > { %1363 = dma.done.wait (%p1541_p12), %s328_s18, 64  }
  0x2f   : > { %1365 = vsyncadd (%p1541_p12), %s328_s18, 4294967232 }
  0x30   : > { %1367 = dma.done.wait (%p72_p1), [#allocation7], 640  }
  0x31   : > { %1369 = vsyncadd (%p72_p1), [#allocation7], 4294966656 }
  0x32   : > { %1371 = dma.done.wait (%p72_p1), [#allocation10], 128  }
  0x33   : > { %1373 = vsyncadd (%p72_p1), [#allocation10], 4294967168  ;;  %v451_v0 = vld [vmem:[#allocation9] sm:$0xff]  ;;  %v1588_v1 = vld [vmem:[#allocation8] sm:$0xff]  ;;  %s1411_s7 = smov 72   ;;  %s1412_s30 = smov 8  }
  0x34   : > { %v985_v2 = vld [vmem:[#allocation6 + $0x18] sm:$0xff]  ;;  %597 = vrot.lane.b32.xlu2 %v451_v0, %s1411_s7  ;;  %454 = vrot.lane.b32.xlu0 %v451_v0, %s1412_s30  ;;  %v984_v3 = vld [vmem:[#allocation6 + $0x10] sm:$0xff]  ;;  %v983_v4 = vld [vmem:[#allocation6 + $0x8] sm:$0xff]  ;;  %s1788_s11 = smov 64   ;;  %s1414_s10 = smov 88   ;;  %vm427_vm0 = vcmask 523264  }
  0x35   : > { %464 = vrot.lane.b32.xlu1 %v1588_v1, %s1412_s30  ;;  %435 = vmatpush.bf16.msra.mxu0 %v985_v2  ;;  %s1415_s16 = smov 80   ;;  %v982_v5 = vld [vmem:[#allocation6] sm:$0xff]  ;;  %v394_v6 = vld [vmem:[%s331_s17] sm:$0xf]  ;;  %s1416_s20 = smov 24   ;;  %vm474_vm1 = vcmask 64512  }
  0x36   : > { %s1417_s28 = smov 16   ;;  %s1418_s29 = smov 40   ;;  %vm477_vm2 = vcmask 125952  }
  0x37   : > { %s1419_s12 = smov 32   ;;  %s1420_s9 = smov 56  }
  0x38   : > { %s1421_s19 = smov 48   ;;  %s1422_s18 = smov 120  }
  0x39   : > { %436 = vmatpush.bf16.msra.mxu0 %v984_v3  ;;  %s946_s17 = sshll.u32 %s1572_s1, 4 }
  0x3c   : > { %610 = vrot.lane.b32.xlu2 %v451_v0, %s1788_s11  ;;  %640 = vrot.lane.b32.xlu0 %v451_v0, %s1414_s10 }
  0x3d   : > { %653 = vrot.lane.b32.xlu1 %v451_v0, %s1415_s16  ;;  %437 = vmatpush.bf16.msra.mxu0 %v983_v4 }
  0x41   : > { %438 = vmatpush.bf16.msra.mxu0 %v982_v5 }
  0x44   : > { %483 = vrot.lane.b32.xlu2 %v451_v0, %s1416_s20  ;;  %496 = vrot.lane.b32.xlu0 %v451_v0, %s1417_s28 }
  0x45   : > { %521 = vrot.lane.b32.xlu1 %v451_v0, %s1418_s29  ;;  %965 = vmatmul.msk.bf16.vlgmr.msra.gmra.mxu0 %vm427_vm0, %v394_v6 }
  0x4c   : > { %534 = vrot.lane.b32.xlu2 %v451_v0, %s1419_s12  ;;  %559 = vrot.lane.b32.xlu0 %v451_v0, %s1420_s9 }
  0x4d   : > { %572 = vrot.lane.b32.xlu1 %v451_v0, %s1421_s19 }
  0x54   : > { %606 = vrot.lane.b32.xlu0 %v1588_v1, %s1411_s7  ;;  %479 = vrot.lane.b32.xlu2 %v1588_v1, %s1417_s28  ;;  %s1641_s7 = scalar_lea.vmem [#allocation11], %s946_s17 }
  0x55   : > { %492 = vrot.lane.b32.xlu1 %v1588_v1, %s1416_s20  ;;  %s947_s20 = sshll.u32 %s1572_s1, 3 }
  0x5c   : > { %517 = vrot.lane.b32.xlu0 %v1588_v1, %s1419_s12  ;;  %593 = vrot.lane.b32.xlu2 %v1588_v1, %s1788_s11 }
  0x5d   : > { %636 = vrot.lane.b32.xlu1 %v1588_v1, %s1415_s16 }
  0x64   : > { %568 = vrot.lane.b32.xlu0 %v1588_v1, %s1420_s9  ;;  %649 = vrot.lane.b32.xlu2 %v1588_v1, %s1414_s10  ;;  %s1424_s10 = smov 96  }
  0x65   : > { %530 = vrot.lane.b32.xlu1 %v1588_v1, %s1418_s29  ;;  %s378_s29 = scalar_lea.vmem [#allocation12], %s947_s20 }
  0x6c   : > { %555 = vrot.lane.b32.xlu2 %v1588_v1, %s1421_s19 }
  0x8e   : > { %v598_v8 = vpop.permute.xlu2 %597 }
  0x96   : > { %v611_v10 = vpop.permute.xlu2 %610 }
  0x9e   : > { %v484_v19 = vpop.permute.xlu2 %483 }
  0xa6   : > { %v455_v7 = vpop.permute.xlu0 %454  ;;  %v535_v29 = vpop.permute.xlu2 %534 }
  0xa7   : > { %v465_v15 = vpop.permute.xlu1 %464 }
  0xae   : > { %v641_v9 = vpop.permute.xlu0 %640  ;;  %v480_v34 = vpop.permute.xlu2 %479 }
  0xaf   : > { %v654_v23 = vpop.permute.xlu1 %653 }
  0xb6   : > { %v497_v17 = vpop.permute.xlu0 %496  ;;  %v594_v35 = vpop.permute.xlu2 %593 }
  0xb7   : > { %v522_v28 = vpop.permute.xlu1 %521 }
  0xbe   : > { %v560_v24 = vpop.permute.xlu0 %559  ;;  %v650_v38 = vpop.permute.xlu2 %649 }
  0xbf   : > { %v573_v32 = vpop.permute.xlu1 %572 }
  0xc2   : > { %v1615_v11 = vpop.f32.mrf.mxu0 }
  0xc3   : > { %v613_v12 = vmul.f32 %v611_v10, %v1615_v11  ;;  %v468_v13 = vmul.f32 %v451_v0, %v1615_v11  ;;  %v457_v14 = vmul.f32 %v455_v7, %v1615_v11  ;;  %v467_v16 = vmul.f32 %v465_v15, %v1615_v11 }
  0xc4   : > { %v499_v20 = vmul.f32 %v497_v17, %v1615_v11  ;;  %v600_v21 = vmul.f32 %v598_v8, %v1615_v11  ;;  %v486_v22 = vmul.f32 %v484_v19, %v1615_v11  ;;  %v562_v25 = vmul.f32 %v560_v24, %v1615_v11 }
  0xc5   : > { %615 = vrot.lane.b32.xlu2 %v613_v12, %s1412_s30  ;;  %470 = vrot.lane.b32.xlu1 %v468_v13, %s1412_s30  ;;  %v656_v26 = vmul.f32 %v654_v23, %v1615_v11  ;;  %v643_v27 = vmul.f32 %v641_v9, %v1615_v11  ;;  %v537_v30 = vmul.f32 %v535_v29, %v1615_v11 }
  0xc6   : > { %459 = vrot.lane.b32.xlu0 %v457_v14, %s1422_s18  ;;  %v524_v31 = vmul.f32 %v522_v28, %v1615_v11  ;;  %v575_v33 = vmul.f32 %v573_v32, %v1615_v11  ;;  %v607_v37 = vpop.permute.xlu0 %606  ;;  %v556_v41 = vpop.permute.xlu2 %555  ;;  %v452_v46 = vmul.f32 %v1588_v1, %v1615_v11  ;;  %v596_v54 = vmul.f32 %v594_v35, %v1615_v11 }
  0xc7   : > { %v493_v36 = vpop.permute.xlu1 %492  ;;  %v609_v52 = vmul.f32 %v607_v37, %v1615_v11  ;;  %v482_v57 = vmul.f32 %v480_v34, %v1615_v11  ;;  %v652_v1 = vmul.f32 %v650_v38, %v1615_v11  ;;  %v630_v8 = vpack.c.bf16 %v1615_v11, %v1615_v11 }
  0xc8   : > { %v495_v55 = vmul.f32 %v493_v36, %v1615_v11 }
  0xca   : > { %v442_v18 = vpop.f32.mrf.mxu0 }
  0xcb   : > { %v558_v18 = vmul.f32 %v556_v41, %v1615_v11 }
  0xcd   : > { %501 = vrot.lane.b32.xlu2 %v499_v20, %s1412_s30  ;;  %602 = vrot.lane.b32.xlu1 %v600_v21, %s1422_s18 }
  0xce   : > { %488 = vrot.lane.b32.xlu0 %v486_v22, %s1422_s18  ;;  %v518_v40 = vpop.permute.xlu0 %517 }
  0xcf   : > { %v637_v39 = vpop.permute.xlu1 %636  ;;  %v520_v10 = vmul.f32 %v518_v40, %v1615_v11 }
  0xd0   : > { %v639_v2 = vmul.f32 %v637_v39, %v1615_v11 }
  0xd5   : > { %564 = vrot.lane.b32.xlu2 %v562_v25, %s1422_s18  ;;  %658 = vrot.lane.b32.xlu1 %v656_v26, %s1412_s30 }
  0xd6   : > { %645 = vrot.lane.b32.xlu0 %v643_v27, %s1422_s18  ;;  %v569_v43 = vpop.permute.xlu0 %568 }
  0xd7   : > { %v531_v42 = vpop.permute.xlu1 %530  ;;  %v571_v19 = vmul.f32 %v569_v43, %v1615_v11 }
  0xd8   : > { %v533_v9 = vmul.f32 %v531_v42, %v1615_v11 }
  0xdd   : > { %539 = vrot.lane.b32.xlu1 %v537_v30, %s1412_s30 }
  0xde   : > { %526 = vrot.lane.b32.xlu0 %v524_v31, %s1422_s18  ;;  %s684_s18 = sand.u32 1, %s1492_s27  }
  0xe6   : > { %577 = vrot.lane.b32.xlu0 %v575_v33, %s1412_s30  ;;  %s1423_s30 = smov 112  }
 0x11f   : > { %v616_v44 = vpop.permute.xlu2 %615 }
 0x120   : > { %v618_v58 = vadd.f32 %v616_v44, %v609_v52 }
 0x127   : > { %v502_v53 = vpop.permute.xlu2 %501 }
 0x128   : > { %v504_v61 = vadd.f32 %v502_v53, %v495_v55 }
 0x12f   : > { %v565_v17 = vpop.permute.xlu2 %564 }
 0x130   : > { %v567_v21 = vsub.f32 %v558_v18, %v565_v17 }
 0x137   : > { %v471_v45 = vpop.permute.xlu1 %470 }
 0x138   : > { %v473_v47 = vadd.f32 %v471_v45, %v467_v16  ;;  %v460_v48 = vpop.permute.xlu0 %459 }
 0x139   : > { %v462_v49 = vsub.f32 %v452_v46, %v460_v48 }
 0x13b   : > { %v475_v50 = vsel %vm474_vm1, %v462_v49, %v473_v47 }
 0x13c   : > { %v476_v51 = vpack.c.bf16 %v475_v50, %v475_v50 }
 0x13e   : > { %478 = vst.msk [vmem:[%s1641_s7] sm:$0xf] %vm477_vm2, %v476_v51 }
 0x13f   : > { %v603_v56 = vpop.permute.xlu1 %602 }
 0x140   : > { %v605_v59 = vsub.f32 %v596_v54, %v603_v56  ;;  %v489_v60 = vpop.permute.xlu0 %488 }
 0x141   : > { %v491_v62 = vsub.f32 %v482_v57, %v489_v60 }
 0x142   : > { %v1109_v63 = vpack.i.bf16 %v618_v58, %v605_v59 }
 0x143   : > { %v1119_v0 = vpack.i.bf16 %v504_v61, %v491_v62 }
 0x144   : > { %1110 = vrot.lane.b32.xlu1 %v1109_v63, %s1788_s11 }
 0x145   : > { %1120 = vrot.lane.b32.xlu0 %v1119_v0, %s1423_s30  ;;  %s1681_s30 = scalar_lea.sflag [#allocation13], %s684_s18 }
 0x147   : > { %v659_v3 = vpop.permute.xlu1 %658 }
 0x148   : > { %v661_v4 = vadd.f32 %v659_v3, %v652_v1  ;;  %v646_v5 = vpop.permute.xlu0 %645 }
 0x149   : > { %v648_v6 = vsub.f32 %v639_v2, %v646_v5 }
 0x14b   : > { %v1114_v7 = vpack.i.bf16 %v661_v4, %v648_v6 }
 0x14d   : > { %632 = vrot.lane.b32.xlu0 %v630_v8, %s1419_s12  ;;  %1115 = vrot.lane.b32.xlu2 %v1114_v7, %s1421_s19  ;;  %s1787_s12 = sshll.u32 %s1396_s24, 3 }
 0x14f   : > { %v540_v12 = vpop.permute.xlu1 %539 }
 0x150   : > { %v542_v13 = vadd.f32 %v540_v12, %v533_v9  ;;  %v527_v14 = vpop.permute.xlu0 %526 }
 0x151   : > { %v529_v15 = vsub.f32 %v520_v10, %v527_v14 }
 0x153   : > { %v1124_v16 = vpack.i.bf16 %v542_v13, %v529_v15 }
 0x155   : > { %1125 = vrot.lane.b32.xlu1 %v1124_v16, %s1424_s10 }
 0x158   : > { %v578_v20 = vpop.permute.xlu0 %577 }
 0x159   : > { %v580_v22 = vadd.f32 %v578_v20, %v571_v19 }
 0x15b   : > { %v1129_v23 = vpack.i.bf16 %v580_v22, %v567_v21 }
 0x15d   : > { %674 = vrot.lane.b32.xlu1 %v630_v8, %s1417_s28  ;;  %1130 = vrot.lane.b32.xlu2 %v1129_v23, %s1415_s16  ;;  %s720_s28 = scalar_lea.hbm %s1784_s5, %s1787_s12  ;;  %s721_s16 = sshll.u32 %s378_s29, 4  ;;  %s722_s16 = int_to_ptr.vmem [resolvable:$true] %s721_s16 }
 0x15e   : > { %s723_s17 = sshll.u32 %s720_s28, 4  ;;  %s1274_s28 = scalar_lea.hbm %s1784_s5, 16  ;;  %s724_s17 = int_to_ptr.hbm [resolvable:$true] %s723_s17 }
 0x15f   : > { %s1268_s27 = sshra.s32 %s724_s17, 4  ;;  %s1269_s27 = int_to_ptr.hbm [resolvable:$true] %s1268_s27 }
 0x160   : > { %s1270_s10 = scalar_lea.hbm %s1269_s27, 8  ;;  %p1275_p10 = scmp.lt.s32.totalorder %s1269_s27, %s1784_s5 }
 0x161   : > { %p1271_p1 = scmp.ne.s32.totalorder %s1269_s27, %s1270_s10  ;;  %p1276_p11 = scmp.lt.s32.totalorder %s1274_s28, %s1270_s10 }
 0x163   : > { %p1272_p3 = pnand %p1271_p1, %p1550_p4  ;;  %p1277_p12 = por %p1276_p11, %p1275_p10 }
 0x165   : > { %p1273_p9 = pneg %p1272_p3 }
 0x167   : > { %p1278_p13 = pnand %p1277_p12, %p1273_p9 }
 0x1a7   : > { %v1116_v24 = vpop.permute.xlu2 %1115 }
 0x1a8   : > { %v1118_v25 = vunpack.i.h.bf16 %v1116_v24  ;;  %v1117_v26 = vunpack.i.l.bf16 %v1116_v24 }
 0x1aa   : > { %v670_v27 = vsel %vm474_vm1, %v1117_v26, %v1118_v25 }
 0x1ab   : > { %v671_v28 = vpack.c.bf16 %v670_v27, %v670_v27 }
 0x1ad   : > { %969 = vst.msk [vmem:[%s378_s29 + $0x4] sm:$0xf] %vm477_vm2, %v671_v28 }
 0x1b6   : > { %v1111_v11 = vpop.permute.xlu1 %1110 }
 0x1b7   : > { %v1113_v29 = vunpack.i.h.bf16 %v1111_v11  ;;  %v1112_v30 = vunpack.i.l.bf16 %v1111_v11  ;;  %v1131_v31 = vpop.permute.xlu2 %1130  ;;  %v1121_v32 = vpop.permute.xlu0 %1120 }
 0x1b8   : > { %v1133_v33 = vunpack.i.h.bf16 %v1131_v31  ;;  %v1132_v34 = vunpack.i.l.bf16 %v1131_v31  ;;  %v1123_v35 = vunpack.i.h.bf16 %v1121_v32  ;;  %v1122_v36 = vunpack.i.l.bf16 %v1121_v32 }
 0x1b9   : > { %v627_v37 = vsel %vm474_vm1, %v1112_v30, %v1113_v29 }
 0x1ba   : > { %v628_v38 = vpack.c.bf16 %v627_v37, %v627_v37  ;;  %v589_v39 = vsel %vm474_vm1, %v1132_v34, %v1133_v33  ;;  %v513_v40 = vsel %vm474_vm1, %v1122_v36, %v1123_v35 }
 0x1bb   : > { %v590_v41 = vpack.c.bf16 %v589_v39, %v589_v39  ;;  %v514_v42 = vpack.c.bf16 %v513_v40, %v513_v40 }
 0x1bc   : > { %629 = vst.msk [vmem:[%s378_s29] sm:$0xf] %vm477_vm2, %v628_v38 }
 0x1bd   : > { %968 = vst.msk [vmem:[%s1641_s7 + $0xc] sm:$0xf] %vm477_vm2, %v590_v41 }
 0x1be   : > { %966 = vst.msk [vmem:[%s1641_s7 + $0x4] sm:$0xf] %vm477_vm2, %v514_v42 }
 0x1bf   : > { %v633_v43 = vpop.permute.xlu0 %632 }
 0x1c0   : > { %1281 = shalt.err (!%p1278_p13)
}
 0x1c1   : > { %s1790_s18 = smov 4   ;;  %s1699_s9 = scalar_lea.vmem [#allocation14], %s947_s20 }
 0x1c2   : > { %1004 = dma.vmem_to_hbm [thread:$0]  (%p1550_p4), %s722_s16, 128, %s724_s17, %s1681_s30, %s1788_s11, %s1788_s11, %s1790_s18  }
 0x1c3   : > { %635 = vst.msk [vmem:[%s1699_s9] sm:$0xf] %vm477_vm2, %v633_v43  ;;  %s986_s12 = sshll.u32 %s1396_s24, 4  ;;  %s1802_s28 = sshll.u32 %s1396_s24, 3 }
 0x1c4   : > { %s702_s19 = scalar_lea.hbm %s1783_s4, %s986_s12  ;;  %s738_s16 = scalar_lea.hbm %s1785_s6, %s1802_s28 }
 0x1c5   : > { %s703_s20 = sshll.u32 %s1641_s7, 4  ;;  %s705_s17 = sshll.u32 %s702_s19, 4  ;;  %s704_s20 = int_to_ptr.vmem [resolvable:$true] %s703_s20  ;;  %s706_s17 = int_to_ptr.hbm [resolvable:$true] %s705_s17 }
 0x1c6   : > { %s739_s11 = sshll.u32 %s1699_s9, 4  ;;  %s741_s18 = sshll.u32 %s738_s16, 4  ;;  %s1715_s11 = int_to_ptr.vmem [resolvable:$true] %s739_s11  ;;  %s1719_s18 = int_to_ptr.hbm [resolvable:$true] %s741_s18 }
 0x1c7   : > { %v1126_v44 = vpop.permute.xlu1 %1125  ;;  %s680_s0 = scalar_lea.sflag [#allocation5], %s1572_s1  ;;  %s1296_s24 = sshra.s32 %s706_s17, 4  ;;  %s1297_s24 = int_to_ptr.hbm [resolvable:$true] %s1296_s24 }
 0x1c8   : > { %v1128_v45 = vunpack.i.h.bf16 %v1126_v44  ;;  %v1127_v46 = vunpack.i.l.bf16 %v1126_v44  ;;  %s1298_s12 = scalar_lea.hbm %s1297_s24, 16  ;;  %s1302_s19 = scalar_lea.hbm %s1783_s4, 32 }
 0x1c9   : > { %p1299_p0 = scmp.ne.s32.totalorder %s1297_s24, %s1298_s12  ;;  %p1303_p8 = scmp.lt.s32.totalorder %s1297_s24, %s1783_s4 }
 0x1ca   : > { %v551_v47 = vsel %vm474_vm1, %v1127_v46, %v1128_v45  ;;  %p1304_p1 = scmp.lt.s32.totalorder %s1302_s19, %s1298_s12 }
 0x1cb   : > { %v552_v48 = vpack.c.bf16 %v551_v47, %v551_v47  ;;  %p1300_p2 = pnand %p1299_p0, %p1550_p4 }
 0x1cc   : > { %p1305_p3 = por %p1304_p1, %p1303_p8 }
 0x1cd   : > { %967 = vst.msk [vmem:[%s1641_s7 + $0x8] sm:$0xf] %vm477_vm2, %v552_v48  ;;  %p1301_p5 = pneg %p1300_p2 }
 0x1cf   : > { %p1306_p9 = pnand %p1305_p3, %p1301_p5 }
 0x1d1   : > { %1309 = shalt.err (!%p1306_p9)
}
 0x1d2   : > { %s1803_s1 = smov 4   ;;  %s1804_s7 = smov 64   ;;  %v675_v49 = vpop.permute.xlu1 %674 }
 0x1d3   : > { %1003 = dma.vmem_to_hbm [thread:$0]  (%p1550_p4), %s704_s20, 256, %s706_s17, %s680_s0, %s1804_s7, %s1804_s7, %s1803_s1  }
 0x1d4   : > { %970 = vst.msk [vmem:[%s1699_s9 + $0x4] sm:$0xf] %vm477_vm2, %v675_v49  ;;  %s1324_s16 = sshra.s32 %s1719_s18, 4  ;;  %s1330_s10 = scalar_lea.hbm %s1785_s6, 16  ;;  %s1325_s16 = int_to_ptr.hbm [resolvable:$true] %s1324_s16 }
 0x1d5   : > { %s1326_s27 = scalar_lea.hbm %s1325_s16, 8  ;;  %p1331_p13 = scmp.lt.s32.totalorder %s1325_s16, %s1785_s6 }
 0x1d6   : > { %p1327_p10 = scmp.ne.s32.totalorder %s1325_s16, %s1326_s27  ;;  %p1332_p0 = scmp.lt.s32.totalorder %s1330_s10, %s1326_s27 }
 0x1d8   : > { %p1328_p11 = pnand %p1327_p10, %p1550_p4  ;;  %p1333_p2 = por %p1332_p0, %p1331_p13 }
 0x1da   : > { %p1329_p12 = pneg %p1328_p11 }
 0x1dc   : > { %p1334_p5 = pnand %p1333_p2, %p1329_p12 }
 0x1de   : > { %1337 = shalt.err (!%p1334_p5)
}
 0x1df   : > { %1005 = dma.vmem_to_hbm [thread:$0]  (%p1550_p4), %s1715_s11, 128, %s1719_s18, %s1681_s30, %s1804_s7, %s1804_s7, %s1803_s1  }
 0x1e0 PF: > { %s756_s9 = sand.u32 1, %s1384_s21   ;;  %p1024_p8 = pnand %p938_p6, %p1558_p7 }
 0x1e1   : > { %s757_s20 = scalar_lea.sflag [#allocation5], %s756_s9 }
 0x1e2   : > { %p1025_p1 = pneg %p1024_p8 }
 0x1e4   : > { %1375 = dma.done.wait (%p1025_p1), %s757_s20, 256  }
 0x1e5   : > { %1377 = vsyncadd (%p1025_p1), %s757_s20, 4294967040  ;;  %s1805_s13 = sadd.s32 4294967294, %s1404_s26  }
 0x1e6   : > { %s766_s17 = sand.u32 1, %s1805_s13  }
 0x1e7   : > { %s767_s0 = scalar_lea.sflag [#allocation13], %s766_s17 }
 0x1e8   : > { %1379 = dma.done.wait (%p1025_p1), %s767_s0, 256  }
 0x1e9   : > { %1381 = vsyncadd (%p1025_p1), %s767_s0, 4294967040  ;;  %s28_s26 = sadd.s32 1, %s1404_s26   ;;  %s1806_s21 = smov %s1388_s22 }
 0x1ea   : > { %p25_p4 = scmp.ge.s32.totalorder %s28_s26, 4   ;;  %s1807_s22 = smov %s1392_s23 }
 0x1eb   : > { %s1808_s23 = smov %s1556_s14  ;;  %s1809_s24 = smov %s1400_s25 }
 0x1ec   : > { %s1810_s25 = smov %s1812_s8  ;;  %27 = sbr.rel (!%p25_p4) target bundleno = 13 (0xd), region = 141 }
 0x1f1   :  { %783 = vsyncpa [#allocation4], 1 }
 0x1f2   :  { %785 = vsyncpa [#allocation4 + $0x1], 1 }
 0x1f3   :  { %786 = vsyncpa [#allocation7], 1 }
 0x1f4   :  { %787 = vsyncpa [#allocation10], 1 }
 0x1f5   :  { %788 = vsyncpa [#allocation5], 1 }
 0x1f6   :  { %790 = vsyncpa [#allocation5 + $0x1], 1 }
 0x1f7   :  { %791 = vsyncpa [#allocation13], 1 }
 0x1f8   :  { %793 = vsyncpa [#allocation13 + $0x1], 1 }

</bundles_post_ra>
